<compile_context>
chip_gen: v5e
topology: v5e:2x2
jax: 0.10.0
libtpu: 0.0.40
codegen_flags: <defaults>
</compile_context>

<pallas_src>
import functools

import jax
import jax.numpy as jnp
from jax.experimental import pallas as pl
from jax.experimental.pallas import tpu as pltpu

KSIZE = 5
PAD = KSIZE // 2

_TILE_TARGET_BYTES = 8 * 1024 * 1024   # per input tile (Pallas double-buffers it)
_VMEM_LIMIT_BYTES = 48 * 1024 * 1024   # safe on v7x (64 MiB VMEM) and v5e/v6e


def _cdiv(a, b):
    return -(-a // b)


def _round_up(v, m):
    return _cdiv(v, m) * m


# ---------------------------------------------------------------------------
# Pallas kernels
# ---------------------------------------------------------------------------
def _row_sum_kernel_1d(x_ref, sum_ref):
    """Whole H*W extent fits in one tile: one row-sum per row block."""
    sum_ref[...] = jnp.sum(x_ref[...].astype(jnp.float32), axis=-1, keepdims=True)


def _row_sum_kernel_2d(x_ref, sum_ref, *, hw, tk, ragged):
    """H*W tiled along grid axis 1 (rare: only for huge spatial extents).

    Accumulates partial row sums into the resident (tm, 1) output block.
    The ragged last column block contains garbage past `hw`, so it is masked.
    """
    j = pl.program_id(1)

    @pl.when(j == 0)
    def _():
        sum_ref[...] = jnp.zeros_like(sum_ref)

    tile = x_ref[...].astype(jnp.float32)
    if ragged:
        col = jax.lax.broadcasted_iota(jnp.int32, tile.shape, 1)
        tile = jnp.where(col < hw - j * tk, tile, 0.0)

    sum_ref[...] += jnp.sum(tile, axis=-1, keepdims=True)


# ---------------------------------------------------------------------------
# Tiling heuristics (byte-budget driven)
# ---------------------------------------------------------------------------
def _pick_tiles(r, hw, itemsize):
    """Pick (tm, tk, multi_col) so tm*tk*itemsize ~= _TILE_TARGET_BYTES."""
    row_g = 16 if itemsize == 2 else 8      # bf16 packs 2 rows per sublane
    lane_g = 128
    hw_phys = _round_up(hw, lane_g)         # physical lane footprint per row

    # Widest column tile such that row_g rows still fit the byte budget.
    max_tk = max(lane_g,
                 (_TILE_TARGET_BYTES // (row_g * itemsize)) // lane_g * lane_g)

    if hw_phys <= max_tk:
        # Single column block covering the whole spatial extent (common case).
        tk, tk_phys, multi_col = hw, hw_phys, False
    else:
        tk, tk_phys, multi_col = max_tk, max_tk, True

    if r <= row_g:
        tm = r                              # full (tiny) row extent -> legal block
    else:
        tm = (_TILE_TARGET_BYTES // (tk_phys * itemsize)) // row_g * row_g
        tm = max(row_g, min(tm, _round_up(r, row_g)))
        # Prefer >= 2 row blocks so the "parallel" axis can shard across
        # v7x's two TensorCores (near-free on single-TC v5e/v6e).
        if _cdiv(r, tm) < 2:
            tm = max(row_g, _round_up(_cdiv(r, 2), row_g))
    return tm, tk, multi_col


def _row_sums(x2):
    """x2: (r, hw) -> (r, 1) float32 row sums via Pallas (no padding pre-pass)."""
    r, hw = x2.shape
    itemsize = jnp.dtype(x2.dtype).itemsize
    tm, tk, multi_col = _pick_tiles(r, hw, itemsize)

    if not multi_col:
        return pl.pallas_call(
            _row_sum_kernel_1d,
            out_shape=jax.ShapeDtypeStruct((r, 1), jnp.float32),
            grid_spec=pltpu.PrefetchScalarGridSpec(
                num_scalar_prefetch=0,
                grid=(_cdiv(r, tm),),
                in_specs=[pl.BlockSpec((tm, tk), lambda i: (i, 0))],
                out_specs=pl.BlockSpec((tm, 1), lambda i: (i, 0)),
            ),
            compiler_params=pltpu.CompilerParams(
                dimension_semantics=("parallel",),
                vmem_limit_bytes=_VMEM_LIMIT_BYTES,
            ),
        )(x2)

    ragged = (hw % tk) != 0
    kernel = functools.partial(_row_sum_kernel_2d, hw=hw, tk=tk, ragged=ragged)
    return pl.pallas_call(
        kernel,
        out_shape=jax.ShapeDtypeStruct((r, 1), jnp.float32),
        grid_spec=pltpu.PrefetchScalarGridSpec(
            num_scalar_prefetch=0,
            grid=(_cdiv(r, tm), _cdiv(hw, tk)),
            in_specs=[pl.BlockSpec((tm, tk), lambda i, j: (i, j))],
            out_specs=pl.BlockSpec((tm, 1), lambda i, j: (i, 0)),
        ),
        compiler_params=pltpu.CompilerParams(
            dimension_semantics=("parallel", "arbitrary"),
            vmem_limit_bytes=_VMEM_LIMIT_BYTES,
        ),
    )(x2)


# ---------------------------------------------------------------------------
# Module forward
# ---------------------------------------------------------------------------
@jax.jit
def linear_eca_gate(x, conv_w):
    """Returns the (N, C) sigmoid gate.  Fused callers should prefer this to
    avoid the full-size expand_as write."""
    n, c, h, w = x.shape
    x2 = x.reshape(n * c, h * w)                     # free, contiguous view

    sums = _row_sums(x2)                             # (N*C, 1) f32 via Pallas
    y = (sums[:, 0] * (1.0 / (h * w))).reshape(n, c)  # channel means, f32

    # Tiny conv1d(1, 1, 5, padding=2, bias=False) + sigmoid in plain JAX.
    y_pad = jnp.pad(y, ((0, 0), (PAD, PAD)))         # (N, C + 4)
    conv = jnp.zeros_like(y)
    for k in range(KSIZE):                           # 5 static taps
        conv = conv + y_pad[:, k:k + c] * conv_w[k]
    return jax.nn.sigmoid(conv)                      # (N, C) f32


@jax.jit
def linear_eca_block(x, conv_w):
    """x: (N, C, H, W); conv_w: (5,) = Conv1d(1,1,5,bias=False).weight.ravel().
    Matches the PyTorch module: returns the gate expanded to x.shape."""
    gate = linear_eca_gate(x, conv_w)
    # Cast BEFORE broadcasting so the narrow dtype is written directly.
    return jnp.broadcast_to(gate.astype(x.dtype)[:, :, None, None], x.shape)


def _reference(x, conv_w):
    """Pure-JAX mirror of the PyTorch forward (returns the expanded gate)."""
    c = x.shape[1]
    y = jnp.mean(x.astype(jnp.float32), axis=(2, 3))  # (N, C)
    y_pad = jnp.pad(y, ((0, 0), (PAD, PAD)))
    conv = jnp.zeros_like(y)
    for k in range(KSIZE):
        conv = conv + y_pad[:, k:k + c] * conv_w[k]
    gate = jax.nn.sigmoid(conv)
    return jnp.broadcast_to(gate.astype(x.dtype)[:, :, None, None], x.shape)


if __name__ == "__main__":
    key = jax.random.PRNGKey(0)
    kx, kw = jax.random.split(key)

    N, C, H, W = 2, 4, 16, 16
    x = jax.random.normal(kx, (N, C, H, W), dtype=jnp.float32)

    # nn.Conv1d(1, 1, 5, bias=False).weight has shape (1, 1, 5); flatten to (5,).
    bound = 1.0 / (KSIZE ** 0.5)
    conv_w = jax.random.uniform(kw, (KSIZE,), dtype=jnp.float32,
                                minval=-bound, maxval=bound)

    out = jax.block_until_ready(linear_eca_block(x, conv_w))
    ref = _reference(x, conv_w)

    assert out.shape == x.shape
    assert jnp.allclose(out, ref, atol=1e-5, rtol=1e-5)
    print("KERNEL_OK")
</pallas_src>

<mosaic_0001>
module attributes {stable_mosaic.version = 11 : i64} {
  func.func @_row_sum_kernel_1d(%arg0: i32, %arg1: memref<8x256xf32, #tpu.memory_space<vmem>>, %arg2: memref<8x1xf32, #tpu.memory_space<vmem>>) attributes {dimension_semantics = [#tpu.dimension_semantics<parallel>], iteration_bounds = array<i64: 1>, scalar_prefetch = 0 : i64, scratch_operands = 0 : i64, tpu.core_type = #tpu.core_type<tc>, window_params = [{transform_indices = @transform_0, window_bounds = array<i64: 8, 256>}, {transform_indices = @transform_1, window_bounds = array<i64: 8, 1>}]} {
    %c0 = arith.constant 0 : index
    %c0_0 = arith.constant 0 : index
    %0 = vector.load %arg1[%c0, %c0_0] : memref<8x256xf32, #tpu.memory_space<vmem>>, vector<8x256xf32>
    %cst = arith.constant dense<0.000000e+00> : vector<8xf32>
    %1 = vector.multi_reduction <add>, %0, %cst [1] : vector<8x256xf32> to vector<8xf32>
    %2 = vector.shape_cast %1 : vector<8xf32> to vector<8x1xf32>
    %c0_1 = arith.constant 0 : index
    %c0_2 = arith.constant 0 : index
    %3 = vector.load %arg2[%c0_1, %c0_2] : memref<8x1xf32, #tpu.memory_space<vmem>>, vector<8x1xf32>
    tpu.vector_store %arg2[%c0_1, %c0_2], %2 {strides = array<i32>} : memref<8x1xf32, #tpu.memory_space<vmem>>, vector<8x1xf32>,
    return
  }
  func.func @transform_0(%arg0: i32) -> (i32, i32) {
    %c0_i32 = arith.constant 0 : i32
    %c0_i32_0 = arith.constant 0 : i32
    return %arg0, %c0_i32 : i32, i32
  }
  func.func @transform_1(%arg0: i32) -> (i32, i32) {
    %c0_i32 = arith.constant 0 : i32
    %c0_i32_0 = arith.constant 0 : i32
    return %arg0, %c0_i32 : i32, i32
  }
}

</mosaic_0001>

<bundles_post_ra>
// kernel: linear_eca_gate.1
= control target key start
LH: loop header
LB: loop body
LE: loop exit
PB: predicated region body
PF: predicated region fallthrough
CT: control target
= control target key end

     0   :  { %vm13_vm0 = vcmask 7168   ;;  %s38_s0 = inlined_call_operand.vmem [shape: f32[8,256], index: 0, kind: input, shape index: {}]   ;;  %s39_s1 = inlined_call_operand.vmem [shape: f32[8,1], index: 1, kind: output, shape index: {}]  }
   0x1   :  { %v8_v0 = vld [vmem:[%s38_s0] sm:$0xff]  ;;  %v9_v1 = vld [vmem:[%s38_s0 + $0x8] sm:$0xff] }
   0x2   :  { %v10_v2 = vadd.f32 %v9_v1, %v8_v0 }
   0x4   :  { %11 = vadd.xlane.f32.xlu0 %v10_v2 }
  0x77   :  { %v12_v3 = vpop.xlane.xlu0 %11 }
  0x78   :  { %14 = vst.msk [vmem:[%s39_s1] sm:$0xff] %vm13_vm0, %v12_v3 }

</bundles_post_ra>
